<compile_context>
chip_gen: v7x
topology: tpu7x:2x2x1
jax: 0.10.0
libtpu: 0.0.40
codegen_flags: <defaults>
</compile_context>

<pallas_src>
import math
import functools

import jax
import jax.numpy as jnp
from jax import lax
from jax.experimental import pallas as pl
from jax.experimental.pallas import tpu as pltpu


# ----------------------------- Pallas kernel -------------------------------- #

def _attend_t(q_t, mem, mem_t, shrink_thres, matmul_dtype, eps=1e-12):
    """One attention stage in transposed (feature-major) layout.

    q_t:   (C, TB)  activations: features on sublanes, batch on lanes.
    mem:   (M, C)   memory bank.
    mem_t: (C, M)   same bank, pre-transposed (keeps both matmuls standard).
    Returns (C, TB) float32.
    """
    # att^T = mem @ q^T : (M, TB).  Softmax / shrink run along the sublane axis.
    att = lax.dot_general(
        mem.astype(matmul_dtype), q_t.astype(matmul_dtype),
        (((1,), (0,)), ((), ())), preferred_element_type=jnp.float32)

    # softmax over memory slots (original dim=1 -> axis 0 in this layout)
    att = att - jnp.max(att, axis=0, keepdims=True)
    att = jnp.exp(att)
    att = att * pl.reciprocal(jnp.sum(att, axis=0, keepdims=True), approx=True)

    if shrink_thres > 0:
        # hard_shrink_relu: relu(x - l) * x / (|x - l| + eps)
        shifted = att - shrink_thres
        att = (jnp.maximum(shifted, 0.0) * att
               * pl.reciprocal(jnp.abs(shifted) + eps, approx=True))
        # F.normalize(p=1, dim=1)
        l1 = jnp.sum(jnp.abs(att), axis=0, keepdims=True)
        att = att * pl.reciprocal(jnp.maximum(l1, eps), approx=True)

    # out^T = mem^T @ att^T : (C, TB)
    return lax.dot_general(
        mem_t.astype(matmul_dtype), att.astype(matmul_dtype),
        (((1,), (0,)), ((), ())), preferred_element_type=jnp.float32)


def _mem_kernel(x_ref, w_ref, wt_ref, pia_ref, piat_ref, sem_ref, semt_ref,
                part_ref, ins_ref, sem_out_ref, *, shrink_thres, matmul_dtype):
    x_t = x_ref[...]                                   # (C, TB)
    out_part = _attend_t(x_t, w_ref[...], wt_ref[...],
                         shrink_thres, matmul_dtype)   # (C, TB)
    out_ins = _attend_t(out_part, pia_ref[...], piat_ref[...],
                        shrink_thres, matmul_dtype)    # (C, TB)
    out_sem = _attend_t(out_ins, sem_ref[...], semt_ref[...],
                        shrink_thres, matmul_dtype)    # (C, TB)
    part_ref[...] = out_part
    ins_ref[...] = out_ins
    sem_out_ref[...] = out_sem


def _choose_tile_b(batch, max_tile_b=2048):
    """Largest lane-aligned (multiple of 128) tile <= max_tile_b that still
    yields >= 2 grid programs when the batch allows it (v7x megacore)."""
    b128 = -(-batch // 128) * 128
    if b128 <= 128:
        return 128
    half = (b128 // 2) // 128 * 128
    return max(128, min(max_tile_b, half))


def _run_memory_unit_t(x_t, weight, pia, sem_att, shrink_thres, *,
                       matmul_dtype=jnp.bfloat16, max_tile_b=2048):
    """x_t: (C, B) float32. Returns (part_t, ins_t, sem_t), each (C, B) f32."""
    C, B = x_t.shape
    M, LT, L = weight.shape[0], pia.shape[0], sem_att.shape[0]

    tile_b = _choose_tile_b(B, max_tile_b)
    grid_b = -(-B // tile_b)
    b_pad = grid_b * tile_b
    if b_pad != B:
        # Ragged batch: pad with zero columns (sliced off below).
        x_t = jnp.pad(x_t, ((0, 0), (0, b_pad - B)))

    # Memory banks (and the activation slab) go to the MXU in matmul_dtype with
    # float32 accumulation; bf16 also halves the resident-weight / input DMA.
    w = weight.astype(matmul_dtype)
    pia_c = pia.astype(matmul_dtype)
    sem_c = sem_att.astype(matmul_dtype)
    x_t = x_t.astype(matmul_dtype)

    kernel = functools.partial(_mem_kernel, shrink_thres=shrink_thres,
                               matmul_dtype=matmul_dtype)
    out_sds = jax.ShapeDtypeStruct((C, b_pad), jnp.float32)

    act_spec = pl.BlockSpec((C, tile_b), lambda i: (0, i))   # lane-dense blocks

    def full(r, c):
        # Constant index map -> block is fetched once and stays resident
        # across grid steps (no per-step re-DMA).
        return pl.BlockSpec((r, c), lambda i: (0, 0))

    part_t, ins_t, sem_t = pl.pallas_call(
        kernel,
        out_shape=(out_sds, out_sds, out_sds),
        grid_spec=pltpu.PrefetchScalarGridSpec(
            num_scalar_prefetch=0,
            grid=(grid_b,),
            in_specs=[
                act_spec,                   # x^T tile
                full(M, C), full(C, M),     # weight, weight^T
                full(LT, C), full(C, LT),   # part_ins_att, part_ins_att^T
                full(L, C), full(C, L),     # sem_att, sem_att^T
            ],
            out_specs=[act_spec, act_spec, act_spec],
        ),
        compiler_params=pltpu.CompilerParams(
            dimension_semantics=("parallel",)),
    )(x_t, w, w.T, pia_c, pia_c.T, sem_c, sem_c.T)

    if b_pad != B:
        part_t, ins_t, sem_t = (o[:, :B] for o in (part_t, ins_t, sem_t))
    return part_t, ins_t, sem_t


# -------------------------- parameter setup (glue) --------------------------- #

def init_params(key, ptt_num, num_cls, part_num, fea_dim):
    mem_dim = ptt_num * num_cls * part_num
    k_w, k_cp, k_bp, k_ci, k_bi = jax.random.split(key, 5)
    stdv = 1.0 / math.sqrt(fea_dim)
    weight = jax.random.uniform(k_w, (mem_dim, fea_dim), jnp.float32, -stdv, stdv)
    # Conv1d(part_num, part_num, 1) params (kernel size 1 squeezed away)
    bnd_p = 1.0 / math.sqrt(part_num)
    w_part = jax.random.uniform(k_cp, (part_num, part_num), jnp.float32, -bnd_p, bnd_p)
    b_part = jax.random.uniform(k_bp, (part_num,), jnp.float32, -bnd_p, bnd_p)
    # Conv1d(ptt_num, ptt_num, 1) params
    bnd_i = 1.0 / math.sqrt(ptt_num)
    w_ins = jax.random.uniform(k_ci, (ptt_num, ptt_num), jnp.float32, -bnd_i, bnd_i)
    b_ins = jax.random.uniform(k_bi, (ptt_num,), jnp.float32, -bnd_i, bnd_i)
    return dict(weight=weight, w_part=w_part, b_part=b_part,
                w_ins=w_ins, b_ins=b_ins)


def _compute_memory_summaries(params, ptt_num, num_cls, part_num, fea_dim):
    """Parameter-only branch of MemoryUnit.forward (reweight layers + avgpool)."""
    weight = params["weight"]                       # (L*T*P, C)
    LT = num_cls * ptt_num
    # weight.view(L*T, C, -1).permute(0, 2, 1) — same contiguous reinterpretation.
    w3 = weight.reshape(LT, fea_dim, part_num).transpose(0, 2, 1)   # (LT, P, C)
    # Conv1d(P, P, 1) over (batch=LT, channels=P, length=C)
    conv_p = jnp.einsum("op,bpc->boc", params["w_part"], w3) \
        + params["b_part"][None, :, None]
    reweight_part = jax.nn.sigmoid(conv_p) * w3     # (LT, P, C)
    part_ins_att = jnp.mean(reweight_part, axis=1)  # avgpool over P -> (LT, C)

    ri = part_ins_att.reshape(num_cls, ptt_num, fea_dim)            # (L, T, C)
    conv_i = jnp.einsum("ot,ltc->loc", params["w_ins"], ri) \
        + params["b_ins"][None, :, None]
    reweight_ins = jax.nn.sigmoid(conv_i) * ri      # (L, T, C)
    sem_att = jnp.mean(reweight_ins, axis=1)        # avgpool over T -> (L, C)
    return part_ins_att, sem_att


# ------------------------------ MemModule API -------------------------------- #

def mem_module_forward(x_nchw, params, *, ptt_num, num_cls, part_num, fea_dim,
                       shrink_thres=0.0025, matmul_dtype=jnp.bfloat16,
                       max_tile_b=2048):
    """Equivalent of MemModule.forward for a 4-D NCHW input.

    Returns (y_sem, y_ins, y_part), each (N, C, H, W), matching the PyTorch module.
    """
    N, C, H, W = x_nchw.shape
    assert C == fea_dim
    # NCHW -> (C, N*H*W): features go to the sublane axis, batch to lanes.
    x_t = jnp.transpose(x_nchw.reshape(N, C, H * W), (1, 0, 2)) \
             .reshape(C, N * H * W).astype(jnp.float32)

    part_ins_att, sem_att = _compute_memory_summaries(
        params, ptt_num, num_cls, part_num, fea_dim)

    part_t, ins_t, sem_t = _run_memory_unit_t(
        x_t, params["weight"], part_ins_att, sem_att, shrink_thres,
        matmul_dtype=matmul_dtype, max_tile_b=max_tile_b)

    def back(y_t):  # (C, N*H*W) -> (N, C, H, W)
        return jnp.transpose(y_t.reshape(C, N, H, W), (1, 0, 2, 3))

    # TODO(synk): `residual=True` path and get_update_query are unused by
    # MemModule.forward and are not implemented.
    return back(sem_t), back(ins_t), back(part_t)


# ------------------------- pure-JAX reference (check) ------------------------ #

def _mem_module_reference(x_nchw, params, *, ptt_num, num_cls, part_num,
                          fea_dim, shrink_thres=0.0025):
    """Float32 pure-JAX reference matching MemModule.forward (validation only)."""
    N, C, H, W = x_nchw.shape
    x = jnp.transpose(x_nchw, (0, 2, 3, 1)).reshape(-1, C).astype(jnp.float32)
    pia, sem = _compute_memory_summaries(params, ptt_num, num_cls, part_num, fea_dim)

    def attend(q, mem):
        att = q @ mem.T
        att = jax.nn.softmax(att, axis=1)
        if shrink_thres > 0:
            shifted = att - shrink_thres
            att = jnp.maximum(shifted, 0.0) * att / (jnp.abs(shifted) + 1e-12)
            att = att / jnp.maximum(jnp.sum(jnp.abs(att), axis=1, keepdims=True), 1e-12)
        return att @ mem

    out_part = attend(x, params["weight"])
    out_ins = attend(out_part, pia)
    out_sem = attend(out_ins, sem)

    def back(y):
        return jnp.transpose(y.reshape(N, H, W, C), (0, 3, 1, 2))
    return back(out_sem), back(out_ins), back(out_part)


# ---------------------------------- main ------------------------------------- #

if __name__ == "__main__":
    # Small, consistent shapes: fea_dim == input channels.
    ptt_num, num_cls, part_num, fea_dim = 2, 4, 2, 32
    N, H, W = 2, 16, 16   # B = N*H*W = 512 -> 2 grid programs of 256 lanes each

    key = jax.random.PRNGKey(0)
    k_params, k_x = jax.random.split(key)
    params = init_params(k_params, ptt_num, num_cls, part_num, fea_dim)
    x = jax.random.normal(k_x, (N, fea_dim, H, W), dtype=jnp.float32)

    fwd = jax.jit(functools.partial(
        mem_module_forward, ptt_num=ptt_num, num_cls=num_cls,
        part_num=part_num, fea_dim=fea_dim, shrink_thres=0.0025))

    y_sem, y_ins, y_part = fwd(x, params)
    jax.block_until_ready((y_sem, y_ins, y_part))

    assert y_sem.shape == (N, fea_dim, H, W)
    assert y_ins.shape == (N, fea_dim, H, W)
    assert y_part.shape == (N, fea_dim, H, W)

    # Sanity check vs. a float32 pure-JAX reference (loose tolerance: the kernel
    # uses bf16 MXU operands + EUP approx reciprocals by design).
    r_sem, r_ins, r_part = _mem_module_reference(
        x, params, ptt_num=ptt_num, num_cls=num_cls, part_num=part_num,
        fea_dim=fea_dim, shrink_thres=0.0025)
    for got, ref in ((y_sem, r_sem), (y_ins, r_ins), (y_part, r_part)):
        assert bool(jnp.all(jnp.isfinite(got)))
        assert bool(jnp.allclose(got, ref, atol=2e-2, rtol=5e-2))

    print("KERNEL_OK")
</pallas_src>

<mosaic_0001>
module attributes {stable_mosaic.version = 11 : i64} {
  func.func @_mem_kernel(%arg0: i32, %arg1: memref<32x256xbf16, #tpu.memory_space<vmem>>, %arg2: memref<16x32xbf16, #tpu.memory_space<vmem>>, %arg3: memref<32x16xbf16, #tpu.memory_space<vmem>>, %arg4: memref<8x32xbf16, #tpu.memory_space<vmem>>, %arg5: memref<32x8xbf16, #tpu.memory_space<vmem>>, %arg6: memref<4x32xbf16, #tpu.memory_space<vmem>>, %arg7: memref<32x4xbf16, #tpu.memory_space<vmem>>, %arg8: memref<32x256xf32, #tpu.memory_space<vmem>>, %arg9: memref<32x256xf32, #tpu.memory_space<vmem>>, %arg10: memref<32x256xf32, #tpu.memory_space<vmem>>) attributes {dimension_semantics = [#tpu.dimension_semantics<parallel>], iteration_bounds = array<i64: 2>, scalar_prefetch = 0 : i64, scratch_operands = 0 : i64, tpu.core_type = #tpu.core_type<tc>, window_params = [{transform_indices = @transform_0, window_bounds = array<i64: 32, 256>}, {pipeline_mode = #tpu.pipeline_mode<synchronous>, transform_indices = @transform_1, window_bounds = array<i64: 16, 32>}, {pipeline_mode = #tpu.pipeline_mode<synchronous>, transform_indices = @transform_2, window_bounds = array<i64: 32, 16>}, {pipeline_mode = #tpu.pipeline_mode<synchronous>, transform_indices = @transform_3, window_bounds = array<i64: 8, 32>}, {pipeline_mode = #tpu.pipeline_mode<synchronous>, transform_indices = @transform_4, window_bounds = array<i64: 32, 8>}, {pipeline_mode = #tpu.pipeline_mode<synchronous>, transform_indices = @transform_5, window_bounds = array<i64: 4, 32>}, {pipeline_mode = #tpu.pipeline_mode<synchronous>, transform_indices = @transform_6, window_bounds = array<i64: 32, 4>}, {transform_indices = @transform_7, window_bounds = array<i64: 32, 256>}, {transform_indices = @transform_8, window_bounds = array<i64: 32, 256>}, {transform_indices = @transform_9, window_bounds = array<i64: 32, 256>}]} {
    %c0 = arith.constant 0 : index
    %c0_0 = arith.constant 0 : index
    %0 = vector.load %arg1[%c0, %c0_0] : memref<32x256xbf16, #tpu.memory_space<vmem>>, vector<32x256xbf16>
    %c0_1 = arith.constant 0 : index
    %c0_2 = arith.constant 0 : index
    %1 = vector.load %arg2[%c0_1, %c0_2] : memref<16x32xbf16, #tpu.memory_space<vmem>>, vector<16x32xbf16>
    %c0_3 = arith.constant 0 : index
    %c0_4 = arith.constant 0 : index
    %2 = vector.load %arg3[%c0_3, %c0_4] : memref<32x16xbf16, #tpu.memory_space<vmem>>, vector<32x16xbf16>
    %cst = arith.constant dense<0.000000e+00> : vector<16x256xf32>
    %3 = tpu.matmul %1, %0, %cst {dimension_numbers = #tpu.dot_dimension_numbers<[1], [0], [0], [1], [0, 0, 1, 1], [], []>} : vector<16x32xbf16>, vector<32x256xbf16>, vector<16x256xf32> -> vector<16x256xf32>
    %cst_5 = arith.constant dense<0xFF800000> : vector<256xf32>
    %4 = vector.multi_reduction <maximumf>, %3, %cst_5 [0] : vector<16x256xf32> to vector<256xf32>
    %5 = vector.shape_cast %4 : vector<256xf32> to vector<1x256xf32>
    %6 = vector.broadcast %5 : vector<1x256xf32> to vector<16x256xf32>
    %7 = arith.subf %3, %6 : vector<16x256xf32>
    %8 = math.exp %7 : vector<16x256xf32>
    %cst_6 = arith.constant dense<0.000000e+00> : vector<256xf32>
    %9 = vector.multi_reduction <add>, %8, %cst_6 [0] : vector<16x256xf32> to vector<256xf32>
    %10 = vector.shape_cast %9 : vector<256xf32> to vector<1x256xf32>
    %11 = tpu.reciprocal %10 {approx = true} : vector<1x256xf32> -> vector<1x256xf32>
    %12 = vector.broadcast %11 : vector<1x256xf32> to vector<16x256xf32>
    %13 = arith.mulf %8, %12 : vector<16x256xf32>
    %cst_7 = arith.constant 2.500000e-03 : f32
    %14 = vector.broadcast %cst_7 : f32 to vector<16x256xf32>
    %15 = arith.subf %13, %14 : vector<16x256xf32>
    %cst_8 = arith.constant 0.000000e+00 : f32
    %16 = vector.broadcast %cst_8 : f32 to vector<16x256xf32>
    %17 = arith.maximumf %15, %16 : vector<16x256xf32>
    %18 = arith.mulf %17, %13 : vector<16x256xf32>
    %19 = math.absf %15 : vector<16x256xf32>
    %cst_9 = arith.constant 9.99999996E-13 : f32
    %20 = vector.broadcast %cst_9 : f32 to vector<16x256xf32>
    %21 = arith.addf %19, %20 : vector<16x256xf32>
    %22 = tpu.reciprocal %21 {approx = true} : vector<16x256xf32> -> vector<16x256xf32>
    %23 = arith.mulf %18, %22 : vector<16x256xf32>
    %24 = math.absf %23 : vector<16x256xf32>
    %cst_10 = arith.constant dense<0.000000e+00> : vector<256xf32>
    %25 = vector.multi_reduction <add>, %24, %cst_10 [0] : vector<16x256xf32> to vector<256xf32>
    %26 = vector.shape_cast %25 : vector<256xf32> to vector<1x256xf32>
    %cst_11 = arith.constant 9.99999996E-13 : f32
    %27 = vector.broadcast %cst_11 : f32 to vector<1x256xf32>
    %28 = arith.maximumf %26, %27 : vector<1x256xf32>
    %29 = tpu.reciprocal %28 {approx = true} : vector<1x256xf32> -> vector<1x256xf32>
    %30 = vector.broadcast %29 : vector<1x256xf32> to vector<16x256xf32>
    %31 = arith.mulf %23, %30 : vector<16x256xf32>
    %32 = arith.truncf %31 : vector<16x256xf32> to vector<16x256xbf16>
    %cst_12 = arith.constant dense<0.000000e+00> : vector<32x256xf32>
    %33 = tpu.matmul %2, %32, %cst_12 {dimension_numbers = #tpu.dot_dimension_numbers<[1], [0], [0], [1], [0, 0, 1, 1], [], []>} : vector<32x16xbf16>, vector<16x256xbf16>, vector<32x256xf32> -> vector<32x256xf32>
    %c0_13 = arith.constant 0 : index
    %c0_14 = arith.constant 0 : index
    %34 = vector.load %arg4[%c0_13, %c0_14] : memref<8x32xbf16, #tpu.memory_space<vmem>>, vector<8x32xbf16>
    %c0_15 = arith.constant 0 : index
    %c0_16 = arith.constant 0 : index
    %35 = vector.load %arg5[%c0_15, %c0_16] : memref<32x8xbf16, #tpu.memory_space<vmem>>, vector<32x8xbf16>
    %36 = arith.truncf %33 : vector<32x256xf32> to vector<32x256xbf16>
    %cst_17 = arith.constant dense<0.000000e+00> : vector<8x256xf32>
    %37 = tpu.matmul %34, %36, %cst_17 {dimension_numbers = #tpu.dot_dimension_numbers<[1], [0], [0], [1], [0, 0, 1, 1], [], []>} : vector<8x32xbf16>, vector<32x256xbf16>, vector<8x256xf32> -> vector<8x256xf32>
    %cst_18 = arith.constant dense<0xFF800000> : vector<256xf32>
    %38 = vector.multi_reduction <maximumf>, %37, %cst_18 [0] : vector<8x256xf32> to vector<256xf32>
    %39 = vector.shape_cast %38 : vector<256xf32> to vector<1x256xf32>
    %40 = vector.broadcast %39 : vector<1x256xf32> to vector<8x256xf32>
    %41 = arith.subf %37, %40 : vector<8x256xf32>
    %42 = math.exp %41 : vector<8x256xf32>
    %cst_19 = arith.constant dense<0.000000e+00> : vector<256xf32>
    %43 = vector.multi_reduction <add>, %42, %cst_19 [0] : vector<8x256xf32> to vector<256xf32>
    %44 = vector.shape_cast %43 : vector<256xf32> to vector<1x256xf32>
    %45 = tpu.reciprocal %44 {approx = true} : vector<1x256xf32> -> vector<1x256xf32>
    %46 = vector.broadcast %45 : vector<1x256xf32> to vector<8x256xf32>
    %47 = arith.mulf %42, %46 : vector<8x256xf32>
    %cst_20 = arith.constant 2.500000e-03 : f32
    %48 = vector.broadcast %cst_20 : f32 to vector<8x256xf32>
    %49 = arith.subf %47, %48 : vector<8x256xf32>
    %cst_21 = arith.constant 0.000000e+00 : f32
    %50 = vector.broadcast %cst_21 : f32 to vector<8x256xf32>
    %51 = arith.maximumf %49, %50 : vector<8x256xf32>
    %52 = arith.mulf %51, %47 : vector<8x256xf32>
    %53 = math.absf %49 : vector<8x256xf32>
    %cst_22 = arith.constant 9.99999996E-13 : f32
    %54 = vector.broadcast %cst_22 : f32 to vector<8x256xf32>
    %55 = arith.addf %53, %54 : vector<8x256xf32>
    %56 = tpu.reciprocal %55 {approx = true} : vector<8x256xf32> -> vector<8x256xf32>
    %57 = arith.mulf %52, %56 : vector<8x256xf32>
    %58 = math.absf %57 : vector<8x256xf32>
    %cst_23 = arith.constant dense<0.000000e+00> : vector<256xf32>
    %59 = vector.multi_reduction <add>, %58, %cst_23 [0] : vector<8x256xf32> to vector<256xf32>
    %60 = vector.shape_cast %59 : vector<256xf32> to vector<1x256xf32>
    %cst_24 = arith.constant 9.99999996E-13 : f32
    %61 = vector.broadcast %cst_24 : f32 to vector<1x256xf32>
    %62 = arith.maximumf %60, %61 : vector<1x256xf32>
    %63 = tpu.reciprocal %62 {approx = true} : vector<1x256xf32> -> vector<1x256xf32>
    %64 = vector.broadcast %63 : vector<1x256xf32> to vector<8x256xf32>
    %65 = arith.mulf %57, %64 : vector<8x256xf32>
    %66 = arith.truncf %65 : vector<8x256xf32> to vector<8x256xbf16>
    %cst_25 = arith.constant dense<0.000000e+00> : vector<32x256xf32>
    %67 = tpu.matmul %35, %66, %cst_25 {dimension_numbers = #tpu.dot_dimension_numbers<[1], [0], [0], [1], [0, 0, 1, 1], [], []>} : vector<32x8xbf16>, vector<8x256xbf16>, vector<32x256xf32> -> vector<32x256xf32>
    %c0_26 = arith.constant 0 : index
    %c0_27 = arith.constant 0 : index
    %68 = vector.load %arg6[%c0_26, %c0_27] : memref<4x32xbf16, #tpu.memory_space<vmem>>, vector<4x32xbf16>
    %c0_28 = arith.constant 0 : index
    %c0_29 = arith.constant 0 : index
    %69 = vector.load %arg7[%c0_28, %c0_29] : memref<32x4xbf16, #tpu.memory_space<vmem>>, vector<32x4xbf16>
    %70 = arith.truncf %67 : vector<32x256xf32> to vector<32x256xbf16>
    %cst_30 = arith.constant dense<0.000000e+00> : vector<4x256xf32>
    %71 = tpu.matmul %68, %70, %cst_30 {dimension_numbers = #tpu.dot_dimension_numbers<[1], [0], [0], [1], [0, 0, 1, 1], [], []>} : vector<4x32xbf16>, vector<32x256xbf16>, vector<4x256xf32> -> vector<4x256xf32>
    %cst_31 = arith.constant dense<0xFF800000> : vector<256xf32>
    %72 = vector.multi_reduction <maximumf>, %71, %cst_31 [0] : vector<4x256xf32> to vector<256xf32>
    %73 = vector.shape_cast %72 : vector<256xf32> to vector<1x256xf32>
    %74 = vector.broadcast %73 : vector<1x256xf32> to vector<4x256xf32>
    %75 = arith.subf %71, %74 : vector<4x256xf32>
    %76 = math.exp %75 : vector<4x256xf32>
    %cst_32 = arith.constant dense<0.000000e+00> : vector<256xf32>
    %77 = vector.multi_reduction <add>, %76, %cst_32 [0] : vector<4x256xf32> to vector<256xf32>
    %78 = vector.shape_cast %77 : vector<256xf32> to vector<1x256xf32>
    %79 = tpu.reciprocal %78 {approx = true} : vector<1x256xf32> -> vector<1x256xf32>
    %80 = vector.broadcast %79 : vector<1x256xf32> to vector<4x256xf32>
    %81 = arith.mulf %76, %80 : vector<4x256xf32>
    %cst_33 = arith.constant 2.500000e-03 : f32
    %82 = vector.broadcast %cst_33 : f32 to vector<4x256xf32>
    %83 = arith.subf %81, %82 : vector<4x256xf32>
    %cst_34 = arith.constant 0.000000e+00 : f32
    %84 = vector.broadcast %cst_34 : f32 to vector<4x256xf32>
    %85 = arith.maximumf %83, %84 : vector<4x256xf32>
    %86 = arith.mulf %85, %81 : vector<4x256xf32>
    %87 = math.absf %83 : vector<4x256xf32>
    %cst_35 = arith.constant 9.99999996E-13 : f32
    %88 = vector.broadcast %cst_35 : f32 to vector<4x256xf32>
    %89 = arith.addf %87, %88 : vector<4x256xf32>
    %90 = tpu.reciprocal %89 {approx = true} : vector<4x256xf32> -> vector<4x256xf32>
    %91 = arith.mulf %86, %90 : vector<4x256xf32>
    %92 = math.absf %91 : vector<4x256xf32>
    %cst_36 = arith.constant dense<0.000000e+00> : vector<256xf32>
    %93 = vector.multi_reduction <add>, %92, %cst_36 [0] : vector<4x256xf32> to vector<256xf32>
    %94 = vector.shape_cast %93 : vector<256xf32> to vector<1x256xf32>
    %cst_37 = arith.constant 9.99999996E-13 : f32
    %95 = vector.broadcast %cst_37 : f32 to vector<1x256xf32>
    %96 = arith.maximumf %94, %95 : vector<1x256xf32>
    %97 = tpu.reciprocal %96 {approx = true} : vector<1x256xf32> -> vector<1x256xf32>
    %98 = vector.broadcast %97 : vector<1x256xf32> to vector<4x256xf32>
    %99 = arith.mulf %91, %98 : vector<4x256xf32>
    %100 = arith.truncf %99 : vector<4x256xf32> to vector<4x256xbf16>
    %cst_38 = arith.constant dense<0.000000e+00> : vector<32x256xf32>
    %101 = tpu.matmul %69, %100, %cst_38 {dimension_numbers = #tpu.dot_dimension_numbers<[1], [0], [0], [1], [0, 0, 1, 1], [], []>} : vector<32x4xbf16>, vector<4x256xbf16>, vector<32x256xf32> -> vector<32x256xf32>
    %c0_39 = arith.constant 0 : index
    %c0_40 = arith.constant 0 : index
    %102 = vector.load %arg8[%c0_39, %c0_40] : memref<32x256xf32, #tpu.memory_space<vmem>>, vector<32x256xf32>
    tpu.vector_store %arg8[%c0_39, %c0_40], %33 {strides = array<i32>} : memref<32x256xf32, #tpu.memory_space<vmem>>, vector<32x256xf32>,
    %c0_41 = arith.constant 0 : index
    %c0_42 = arith.constant 0 : index
    %103 = vector.load %arg9[%c0_41, %c0_42] : memref<32x256xf32, #tpu.memory_space<vmem>>, vector<32x256xf32>
    tpu.vector_store %arg9[%c0_41, %c0_42], %67 {strides = array<i32>} : memref<32x256xf32, #tpu.memory_space<vmem>>, vector<32x256xf32>,
    %c0_43 = arith.constant 0 : index
    %c0_44 = arith.constant 0 : index
    %104 = vector.load %arg10[%c0_43, %c0_44] : memref<32x256xf32, #tpu.memory_space<vmem>>, vector<32x256xf32>
    tpu.vector_store %arg10[%c0_43, %c0_44], %101 {strides = array<i32>} : memref<32x256xf32, #tpu.memory_space<vmem>>, vector<32x256xf32>,
    return
  }
  func.func @transform_0(%arg0: i32) -> (i32, i32) {
    %c0_i32 = arith.constant 0 : i32
    %c0_i32_0 = arith.constant 0 : i32
    return %c0_i32, %arg0 : i32, i32
  }
  func.func @transform_1(%arg0: i32) -> (i32, i32) {
    %c0_i32 = arith.constant 0 : i32
    %c0_i32_0 = arith.constant 0 : i32
    %c0_i32_1 = arith.constant 0 : i32
    return %c0_i32, %c0_i32_0 : i32, i32
  }
  func.func @transform_2(%arg0: i32) -> (i32, i32) {
    %c0_i32 = arith.constant 0 : i32
    %c0_i32_0 = arith.constant 0 : i32
    %c0_i32_1 = arith.constant 0 : i32
    return %c0_i32, %c0_i32_0 : i32, i32
  }
  func.func @transform_3(%arg0: i32) -> (i32, i32) {
    %c0_i32 = arith.constant 0 : i32
    %c0_i32_0 = arith.constant 0 : i32
    %c0_i32_1 = arith.constant 0 : i32
    return %c0_i32, %c0_i32_0 : i32, i32
  }
  func.func @transform_4(%arg0: i32) -> (i32, i32) {
    %c0_i32 = arith.constant 0 : i32
    %c0_i32_0 = arith.constant 0 : i32
    %c0_i32_1 = arith.constant 0 : i32
    return %c0_i32, %c0_i32_0 : i32, i32
  }
  func.func @transform_5(%arg0: i32) -> (i32, i32) {
    %c0_i32 = arith.constant 0 : i32
    %c0_i32_0 = arith.constant 0 : i32
    %c0_i32_1 = arith.constant 0 : i32
    return %c0_i32, %c0_i32_0 : i32, i32
  }
  func.func @transform_6(%arg0: i32) -> (i32, i32) {
    %c0_i32 = arith.constant 0 : i32
    %c0_i32_0 = arith.constant 0 : i32
    %c0_i32_1 = arith.constant 0 : i32
    return %c0_i32, %c0_i32_0 : i32, i32
  }
  func.func @transform_7(%arg0: i32) -> (i32, i32) {
    %c0_i32 = arith.constant 0 : i32
    %c0_i32_0 = arith.constant 0 : i32
    return %c0_i32, %arg0 : i32, i32
  }
  func.func @transform_8(%arg0: i32) -> (i32, i32) {
    %c0_i32 = arith.constant 0 : i32
    %c0_i32_0 = arith.constant 0 : i32
    return %c0_i32, %arg0 : i32, i32
  }
  func.func @transform_9(%arg0: i32) -> (i32, i32) {
    %c0_i32 = arith.constant 0 : i32
    %c0_i32_0 = arith.constant 0 : i32
    return %c0_i32, %arg0 : i32, i32
  }
}

</mosaic_0001>

<bundles_post_ra>
// kernel: mem_module_forward.1
= control target key start
LH: loop header
LB: loop body
LE: loop exit
PB: predicated region body
PF: predicated region fallthrough
CT: control target
= control target key end

     0   :  { %s1537_s30 = smov 0   ;;  %s1539_s10 = smov 0   ;;  %s1719_s0 = inlined_call_operand.vmem [shape: bf16[32,512], index: 0, kind: input, shape index: {}]   ;;  %s1720_s1 = inlined_call_operand.vmem [shape: bf16[16,32], index: 1, kind: input, shape index: {}]   ;;  %s1721_s2 = inlined_call_operand.vmem [shape: bf16[32,16], index: 2, kind: input, shape index: {}]   ;;  %s1722_s3 = inlined_call_operand.vmem [shape: bf16[8,32], index: 3, kind: input, shape index: {}]   ;;  %s1723_s4 = inlined_call_operand.vmem [shape: bf16[32,8], index: 4, kind: input, shape index: {}]   ;;  %s1724_s5 = inlined_call_operand.vmem [shape: bf16[4,32], index: 5, kind: input, shape index: {}]   ;;  %s1725_s6 = inlined_call_operand.vmem [shape: bf16[32,4], index: 6, kind: input, shape index: {}]   ;;  %s1726_s7 = inlined_call_operand.vmem [shape: f32[32,512], index: 7, kind: output, shape index: {0}]   ;;  %s1727_s8 = inlined_call_operand.vmem [shape: f32[32,512], index: 8, kind: output, shape index: {1}]   ;;  %s1728_s9 = inlined_call_operand.vmem [shape: f32[32,512], index: 9, kind: output, shape index: {2}]  }
   0x1   :  { %s1541_s11 = smov 0  }
   0x2 LB: > { %s1553_s12 = sadd.s32 4294967295, %s1484_s11   ;;  %s1556_s13 = sadd.s32 1, %s1484_s11   ;;  %s1484_s11 = sphi %s1541_s11, %s1732_s11   ;;  %s1480_s10 = sphi %s1539_s10, %s1731_s10   ;;  %s1476_s30 = sphi %s1537_s30, %s1730_s30  }
   0x3   : > { %s24_s14 = ssub.s32 %s1484_s11, %s1556_s13  ;;  %s27_s15 = sadd.s32 1, %s1480_s10 }
   0x4   : > { %p25_p0 = scmp.eq.s32.totalorder %s24_s14, 0  ;;  %p34_p1 = scmp.ne.s32.totalorder %s1480_s10, %s1476_s30 }
   0x5   : > { %p35_p2 = scmp.eq.s32.totalorder %s1484_s11, 0  ;;  %p190_p3 = scmp.eq.s32.totalorder %s1553_s12, 1 }
   0x6   : > { %s1566_s16 = scalar_select %p25_p0, %s1480_s10, %s27_s15  }
   0x7   : > { %p36_p4 = por %p35_p2, %p34_p1  ;;  %p1568_p5 = por %p190_p3, %p34_p1 }
   0x8   : > { %p1314_p6 = scmp.ge.s32.totalorder %s1484_s11, 2 }
   0xa   : > { %282 = sbr.rel (%p1314_p6) target bundleno = 24 (0x18), region = 40 }
  0x11   : > { %285 = sbr.rel (!%p36_p4) target bundleno = 24 (0x18), region = 44  ;;  %s287_s18 = sand.u32 (%p36_p4), 1, %s1480_s10  }
  0x12   : > { %s1364_s19 = sshll.u32 (%p36_p4), %s1484_s11, 3  ;;  %s1315_s20 = sshll.u32 (%p36_p4), %s287_s18, 5 }
  0x13   : > { %s292_s23 = scalar_lea.vmem (%p36_p4), %s1719_s0, %s1364_s19  ;;  %s289_s24 = scalar_lea.vmem (%p36_p4), [#allocation2], %s1315_s20 }
  0x14   : > { %v326_v0 = vld [vmem:[%s292_s23] sm:$0xff] (%p36_p4)  ;;  %v328_v1 = vld [vmem:[%s292_s23 + $0x10] sm:$0xff] (%p36_p4) }
  0x15   : > { %v330_v2 = vld [vmem:[%s292_s23 + $0x20] sm:$0xff] (%p36_p4)  ;;  %327 = vst [vmem:[%s289_s24] sm:$0xff] (%p36_p4), %v326_v0  ;;  %329 = vst [vmem:[%s289_s24 + $0x8] sm:$0xff] (%p36_p4), %v328_v1  ;;  %v332_v3 = vld [vmem:[%s292_s23 + $0x30] sm:$0xff] (%p36_p4) }
  0x16   : > { %331 = vst [vmem:[%s289_s24 + $0x10] sm:$0xff] (%p36_p4), %v330_v2  ;;  %333 = vst [vmem:[%s289_s24 + $0x18] sm:$0xff] (%p36_p4), %v332_v3 }
  0x18 PF: > { %p1318_p7 = scmp.ge.s32.totalorder %s1484_s11, 1  ;;  %p338_p8 = scmp.lt.s32.totalorder %s1484_s11, 3 }
  0x1a   : > { %p339_p9 = pnand %p1318_p7, %p338_p8 }
  0x1b   : > { %s345_s25 = sand.u32 (!%p339_p9), 1, %s1476_s30   ;;  %v1486_v4 = vmov (!%p339_p9), 0   ;;  %v1399_v9 = vld [vmem:[%s1720_s1] sm:$0xff] (!%p339_p9)   ;;  %vm427_vm0 = vcmask (!%p339_p9), 261120   ;;  %vm586_vm1 = vcmask (!%p339_p9), 130048   ;;  %vm786_vm2 = vcmask (!%p339_p9), 1043456  }
  0x1c   : > { %342 = sbr.rel (%p339_p9) target bundleno = 1706 (0x6aa), region = 82  ;;  %s1319_s26 = sshll.u32 (!%p339_p9), %s345_s25, 5  ;;  %463 = vmatprep.mubr.bf16.mxu0 (!%p339_p9), %v1486_v4  ;;  %625 = vmatprep.mubr.bf16.mxu1 (!%p339_p9), %v1486_v4  ;;  %vm779_vm3 = vcmask (!%p339_p9), 64512   ;;  %vm992_vm4 = vcmask (!%p339_p9), 1041408   ;;  %vm985_vm5 = vcmask (!%p339_p9), 31744  }
  0x1d   : > { %s347_s27 = scalar_lea.vmem (!%p339_p9), [#allocation2], %s1319_s26  ;;  %s1600_s19 = sshll.u32 (!%p339_p9), %s345_s25, 6 }
  0x1e   : > { %v1393_v5 = vld [vmem:[%s347_s27 + $0x4] ss:$8 sps:$4 sm:$0xff] (!%p339_p9)   ;;  %v1395_v6 = vld [vmem:[%s347_s27] ss:$8 sps:$4 sm:$0xff] (!%p339_p9)   ;;  %v1396_v7 = vld [vmem:[%s347_s27 + $0x14] ss:$8 sps:$4 sm:$0xff] (!%p339_p9)  }
  0x1f   : > { %431 = vmatprep.subr.bf16.mxu0 (!%p339_p9), %v1393_v5  ;;  %v1398_v8 = vld [vmem:[%s347_s27 + $0x10] ss:$8 sps:$4 sm:$0xff] (!%p339_p9)   ;;  %s1603_s20 = scalar_lea.vmem (!%p339_p9), [#allocation3], %s1600_s19  ;;  %s1628_s26 = scalar_lea.vmem (!%p339_p9), [#allocation4], %s1600_s19 }
  0x20   : > { %432 = vmatpush1.bf16.msra.mxu0 (!%p339_p9), %v1395_v6  ;;  %s1657_s18 = scalar_lea.vmem (!%p339_p9), [#allocation5], %s1600_s19 }
  0x21   : > { %433 = vmatprep.subr.bf16.mxu0 (!%p339_p9), %v1396_v7 }
  0x23   : > { %s1365_s19 = sshll.u32 (%p1568_p5), %s1553_s12, 4 }
  0x24   : > { %434 = vmatpush1.bf16.msra.mxu0 %v1398_v8  ;;  %s1093_s22 = scalar_lea.vmem (%p1568_p5), %s1726_s7, %s1365_s19 }
  0x27   : > { %1328 = vmatmul.mubr.msk.bf16.vlgmr.msra.gmra.mrb[0].mxu0 %vm427_vm0, %v1399_v9 }
  0x28   : > { %890 = vmatprep.mubr.bf16.mxu0 %v1486_v4 }
  0xfa   : > { %v465_v10 = vpop.f32.mrb[0].mxu0 }
  0xfb   : > { %v467_v11 = vpop.f32.mrb[1].mxu0 }
  0xfc   : > { %v469_v12 = vpop.f32.mrb[2].mxu0 }
  0xfd   : > { %v474_v13 = vmax.f32 %v465_v10, %v469_v12  ;;  %v471_v14 = vpop.f32.mrb[3].mxu0 }
  0xfe   : > { %v481_v15 = vmax.f32 %v467_v11, %v471_v14 }
  0xff   : > { %v475_v16 = vrot.slane %v474_v13, 4 }
 0x100   : > { %v482_v17 = vrot.slane %v481_v15, 4 }
 0x101   : > { %v476_v18 = vmax.f32 %v474_v13, %v475_v16 }
 0x102   : > { %v483_v19 = vmax.f32 %v481_v15, %v482_v17 }
 0x103   : > { %v477_v20 = vrot.slane %v476_v18, 2 }
 0x104   : > { %v484_v21 = vrot.slane %v483_v19, 2 }
 0x105   : > { %v478_v22 = vmax.f32 %v476_v18, %v477_v20 }
 0x106   : > { %v485_v23 = vmax.f32 %v483_v19, %v484_v21 }
 0x107   : > { %v479_v24 = vrot.slane %v478_v22, 1 }
 0x108   : > { %v486_v25 = vrot.slane %v485_v23, 1 }
 0x109   : > { %v480_v26 = vmax.f32 %v478_v22, %v479_v24 }
 0x10a   : > { %v487_v27 = vmax.f32 %v485_v23, %v486_v25 }
 0x10b   : > { %v488_v28 = vsub.f32 %v465_v10, %v480_v26  ;;  %v490_v29 = vsub.f32 %v469_v12, %v480_v26 }
 0x10c   : > { %v489_v30 = vsub.f32 %v467_v11, %v487_v27  ;;  %v491_v31 = vsub.f32 %v471_v14, %v487_v27 }
 0x10d   : > { %v492_v32 = vmul.f32 1.442695, %v488_v28  ;;  %v496_v33 = vmul.f32 1.442695, %v490_v29 }
 0x10e   : > { %v494_v34 = vmul.f32 1.442695, %v489_v30  ;;  %v498_v35 = vmul.f32 1.442695, %v491_v31 }
 0x10f   : > { %1406 = vpow2.f32 %v492_v32 }
 0x110   : > { %1408 = vpow2.f32 %v496_v33 }
 0x111   : > { %1410 = vpow2.f32 %v494_v34 }
 0x112   : > { %1412 = vpow2.f32 %v498_v35 }
 0x119   : > { %v1407_v36 = vpop.eup %1406 }
 0x11a   : > { %v1409_v37 = vpop.eup %1408 }
 0x11b   : > { %v1411_v38 = vpop.eup %1410  ;;  %v500_v39 = vadd.f32 %v1409_v37, %v1407_v36 }
 0x11c   : > { %v1413_v40 = vpop.eup %1412 }
 0x11d   : > { %v501_v41 = vrot.slane %v500_v39, 4  ;;  %v507_v42 = vadd.f32 %v1413_v40, %v1411_v38 }
 0x11f   : > { %v502_v43 = vadd.f32 %v501_v41, %v500_v39  ;;  %v508_v44 = vrot.slane %v507_v42, 4 }
 0x121   : > { %v503_v45 = vrot.slane %v502_v43, 2  ;;  %v509_v46 = vadd.f32 %v508_v44, %v507_v42 }
 0x123   : > { %v504_v47 = vadd.f32 %v503_v45, %v502_v43  ;;  %v510_v48 = vrot.slane %v509_v46, 2 }
 0x125   : > { %v505_v49 = vrot.slane %v504_v47, 1  ;;  %v511_v50 = vadd.f32 %v510_v48, %v509_v46 }
 0x127   : > { %v506_v51 = vadd.f32 %v505_v49, %v504_v47  ;;  %v512_v52 = vrot.slane %v511_v50, 1 }
 0x129   : > { %1414 = vrcp.f32 %v506_v51  ;;  %v513_v53 = vadd.f32 %v512_v52, %v511_v50 }
 0x12b   : > { %1416 = vrcp.f32 %v513_v53  ;;  %v1400_v53 = vld [vmem:[%s1721_s2] sm:$0xff]  }
 0x133   : > { %v1415_v54 = vpop.eup %1414 }
 0x134   : > { %v516_v55 = vmul.f32 %v1415_v54, %v1407_v36  ;;  %v518_v56 = vmul.f32 %v1415_v54, %v1409_v37  ;;  %v1401_v54 = vld [vmem:[%s1721_s2 + $0x8] sm:$0xff]  }
 0x135   : > { %v1417_v57 = vpop.eup %1416 }
 0x136   : > { %v517_v58 = vmul.f32 %v1417_v57, %v1411_v38  ;;  %v519_v59 = vmul.f32 %v1417_v57, %v1413_v40  ;;  %v1329_v60 = vadd.f32 -0.0025, %v516_v55  ;;  %v1331_v61 = vadd.f32 -0.0025, %v518_v56 }
 0x138   : > { %v1330_v62 = vadd.f32 -0.0025, %v517_v58  ;;  %v1332_v63 = vadd.f32 -0.0025, %v519_v59  ;;  %v532_v0 = vand.u32 2147483647, %v1329_v60 }
 0x139   : > { %v534_v1 = vand.u32 2147483647, %v1331_v61  ;;  %v524_v9 = vmax.f32 %v1329_v60, 0.0  ;;  %v526_v12 = vmax.f32 %v1331_v61, 0.0 }
 0x13a   : > { %v533_v2 = vand.u32 2147483647, %v1330_v62  ;;  %v535_v3 = vand.u32 2147483647, %v1332_v63  ;;  %v536_v5 = vadd.f32 1e-12, %v532_v0 }
 0x13b   : > { %v538_v8 = vadd.f32 1e-12, %v534_v1  ;;  %v525_v10 = vmax.f32 %v1330_v62, 0.0  ;;  %v527_v11 = vmax.f32 %v1332_v63, 0.0  ;;  %v528_v13 = vmul.f32 %v524_v9, %v516_v55 }
 0x13c   : > { %v537_v6 = vadd.f32 1e-12, %v533_v2  ;;  %v539_v7 = vadd.f32 1e-12, %v535_v3  ;;  %1418 = vrcp.f32 %v536_v5  ;;  %v530_v21 = vmul.f32 %v526_v12, %v518_v56  ;;  %v646_v3 = vld [vmem:[%s1722_s3] sm:$0xf] }
 0x13d   : > { %v529_v15 = vmul.f32 %v525_v10, %v517_v58  ;;  %v531_v17 = vmul.f32 %v527_v11, %v519_v59 }
 0x13e   : > { %1420 = vrcp.f32 %v537_v6 }
 0x13f   : > { %1422 = vrcp.f32 %v539_v7 }
 0x140   : > { %1424 = vrcp.f32 %v538_v8 }
 0x146   : > { %v1419_v14 = vpop.eup %1418 }
 0x147   : > { %v544_v18 = vmul.f32 %v1419_v14, %v528_v13 }
 0x148   : > { %v1421_v16 = vpop.eup %1420 }
 0x149   : > { %v1423_v19 = vpop.eup %1422  ;;  %v545_v20 = vmul.f32 %v1421_v16, %v529_v15  ;;  %v548_v26 = vand.u32 2147483647, %v544_v18 }
 0x14a   : > { %v1425_v22 = vpop.eup %1424  ;;  %v547_v23 = vmul.f32 %v1423_v19, %v531_v17 }
 0x14b   : > { %v549_v24 = vand.u32 2147483647, %v545_v20  ;;  %v546_v25 = vmul.f32 %v1425_v22, %v530_v21 }
 0x14c   : > { %v551_v27 = vand.u32 2147483647, %v547_v23 }
 0x14d   : > { %v550_v28 = vand.u32 2147483647, %v546_v25 }
 0x14e   : > { %v559_v29 = vadd.f32 %v551_v27, %v549_v24 }
 0x14f   : > { %v552_v30 = vadd.f32 %v550_v28, %v548_v26 }
 0x150   : > { %v560_v31 = vrot.slane %v559_v29, 4 }
 0x151   : > { %v553_v32 = vrot.slane %v552_v30, 4 }
 0x152   : > { %v561_v33 = vadd.f32 %v560_v31, %v559_v29 }
 0x153   : > { %v554_v34 = vadd.f32 %v553_v32, %v552_v30 }
 0x154   : > { %v562_v35 = vrot.slane %v561_v33, 2 }
 0x155   : > { %v555_v36 = vrot.slane %v554_v34, 2 }
 0x156   : > { %v563_v37 = vadd.f32 %v562_v35, %v561_v33 }
 0x157   : > { %v556_v38 = vadd.f32 %v555_v36, %v554_v34 }
 0x158   : > { %v564_v39 = vrot.slane %v563_v37, 1 }
 0x159   : > { %v557_v40 = vrot.slane %v556_v38, 1 }
 0x15a   : > { %v565_v41 = vadd.f32 %v564_v39, %v563_v37 }
 0x15b   : > { %v558_v42 = vadd.f32 %v557_v40, %v556_v38 }
 0x15c   : > { %v567_v43 = vmax.f32 %v565_v41, 1e-12 }
 0x15d   : > { %v566_v44 = vmax.f32 %v558_v42, 1e-12 }
 0x15e   : > { %1426 = vrcp.f32 %v567_v43 }
 0x15f   : > { %1428 = vrcp.f32 %v566_v44 }
 0x168   : > { %v1427_v45 = vpop.eup %1426 }
 0x169   : > { %v1429_v46 = vpop.eup %1428  ;;  %v571_v47 = vmul.f32 %v1427_v45, %v545_v20  ;;  %v573_v48 = vmul.f32 %v1427_v45, %v547_v23 }
 0x16a   : > { %v570_v49 = vmul.f32 %v1429_v46, %v544_v18  ;;  %v572_v50 = vmul.f32 %v1429_v46, %v546_v25 }
 0x16b   : > { %v575_v51 = vpack.c.bf16 %v573_v48, %v571_v47 }
 0x16c   : > { %v574_v52 = vpack.c.bf16 %v572_v50, %v570_v49 }
 0x16d   : > { %593 = vmatprep.subr.bf16.mxu1 %v575_v51 }
 0x16e   : > { %594 = vmatpush1.bf16.msra.mxu1 %v574_v52 }
 0x171   : > { %1335 = vmatmul.mubr.msk.bf16.vlgmr.msra.gmra.mrb[0].mxu1 %vm586_vm1, %v1400_v53 }
 0x172   : > { %635 = vmatprep.mubr.bf16.mxu1 %v1486_v4 }
 0x179   : > { %1336 = vmatmul.mubr.msk.bf16.gmra.mrb[4].mxu1 %vm586_vm1, %v1401_v54 }
 0x17a   : > { %690 = vmatprep.mubr.bf16.mxu1 %v1486_v4 }
 0x244   : > { %v627_v55 = vpop.f32.mrb[0].mxu1 }
 0x245   : > { %1052 = vst [vmem:[%s1603_s20] sm:$0xff] %v627_v55  ;;  %v629_v56 = vpop.f32.mrb[1].mxu1 }
 0x246   : > { %1053 = vst [vmem:[%s1603_s20 + $0x8] sm:$0xff] %v629_v56  ;;  %v631_v57 = vpop.f32.mrb[2].mxu1 }
 0x247   : > { %v651_v58 = vpack.c.bf16 %v631_v57, %v627_v55  ;;  %1054 = vst [vmem:[%s1603_s20 + $0x10] sm:$0xff] %v631_v57  ;;  %v633_v59 = vpop.f32.mrb[3].mxu1 }
 0x248   : > { %v652_v60 = vpack.c.bf16 %v633_v59, %v629_v56  ;;  %1055 = vst [vmem:[%s1603_s20 + $0x18] sm:$0xff] %v633_v59 }
 0x24a   : > { %658 = vmatprep.subr.bf16.mxu1 %v652_v60 }
 0x24b   : > { %659 = vmatpush1.bf16.msra.mxu1 %v651_v58 }
 0x24c   : > { %v637_v61 = vpop.f32.mrb[4].mxu1 }
 0x24d   : > { %1056 = vst [vmem:[%s1603_s20 + $0x20] sm:$0xff] %v637_v61  ;;  %v639_v62 = vpop.f32.mrb[5].mxu1 }
 0x24e   : > { %1057 = vst [vmem:[%s1603_s20 + $0x28] sm:$0xff] %v639_v62  ;;  %v641_v63 = vpop.f32.mrb[6].mxu1 }
 0x24f   : > { %v653_v0 = vpack.c.bf16 %v641_v63, %v637_v61  ;;  %1058 = vst [vmem:[%s1603_s20 + $0x30] sm:$0xff] %v641_v63  ;;  %v643_v1 = vpop.f32.mrb[7].mxu1 }
 0x250   : > { %v654_v2 = vpack.c.bf16 %v643_v1, %v639_v62  ;;  %1059 = vst [vmem:[%s1603_s20 + $0x38] sm:$0xff] %v643_v1 }
 0x252   : > { %660 = vmatprep.subr.bf16.mxu1 %v654_v2 }
 0x253   : > { %661 = vmatpush1.bf16.msra.mxu1 %v653_v0 }
 0x256   : > { %1337 = vmatmul.mubr.msk.bf16.vlgmr.msra.gmra.mrb[8].mxu1 %vm427_vm0, %v646_v3 }
 0x257   : > { %825 = vmatprep.mubr.bf16.mxu1 %v1486_v4 }
 0x329   : > { %v692_v5 = vpop.f32.mrb[8].mxu1 }
 0x32a   : > { %v699_v6 = vrot.slane %v692_v5, 4  ;;  %v694_v7 = vpop.f32.mrb[9].mxu1 }
 0x32b   : > { %v705_v8 = vrot.slane %v694_v7, 4  ;;  %v696_v9 = vpop.f32.mrb[10].mxu1 }
 0x32c   : > { %v700_v10 = vmax.f32 %v692_v5, %v699_v6  ;;  %v697_v11 = vpop.f32.mrb[11].mxu1 }
 0x32d   : > { %v706_v12 = vmax.f32 %v694_v7, %v705_v8 }
 0x32e   : > { %v701_v13 = vrot.slane %v700_v10, 2 }
 0x32f   : > { %v707_v14 = vrot.slane %v706_v12, 2 }
 0x330   : > { %v702_v15 = vmax.f32 %v700_v10, %v701_v13 }
 0x331   : > { %v708_v16 = vmax.f32 %v706_v12, %v707_v14 }
 0x332   : > { %v703_v17 = vrot.slane %v702_v15, 1 }
 0x333   : > { %v709_v18 = vrot.slane %v708_v16, 1 }
 0x334   : > { %v704_v19 = vmax.f32 %v702_v15, %v703_v17  ;;  %v1402_v17 = vld [vmem:[%s1723_s4] sm:$0xff]  }
 0x335   : > { %v710_v20 = vmax.f32 %v708_v16, %v709_v18  ;;  %v1403_v18 = vld [vmem:[%s1723_s4 + $0x8] sm:$0xff]  }
 0x336   : > { %v711_v21 = vsub.f32 %v692_v5, %v704_v19 }
 0x337   : > { %v712_v22 = vsub.f32 %v694_v7, %v710_v20 }
 0x338   : > { %v713_v23 = vmul.f32 1.442695, %v711_v21 }
 0x339   : > { %v715_v24 = vmul.f32 1.442695, %v712_v22 }
 0x33a   : > { %1430 = vpow2.f32 %v713_v23 }
 0x33b   : > { %1432 = vpow2.f32 %v715_v24 }
 0x344   : > { %v1431_v25 = vpop.eup %1430 }
 0x345   : > { %v1433_v26 = vpop.eup %1432  ;;  %v717_v27 = vrot.slane %v1431_v25, 4 }
 0x346   : > { %v723_v28 = vrot.slane %v1433_v26, 4 }
 0x347   : > { %v718_v29 = vadd.f32 %v1431_v25, %v717_v27 }
 0x348   : > { %v724_v30 = vadd.f32 %v1433_v26, %v723_v28 }
 0x349   : > { %v719_v31 = vrot.slane %v718_v29, 2 }
 0x34a   : > { %v725_v32 = vrot.slane %v724_v30, 2 }
 0x34b   : > { %v720_v33 = vadd.f32 %v719_v31, %v718_v29  ;;  %v846_v31 = vld [vmem:[%s1724_s5] sm:$0x3] }
 0x34c   : > { %v726_v34 = vadd.f32 %v725_v32, %v724_v30 }
 0x34d   : > { %v721_v35 = vrot.slane %v720_v33, 1 }
 0x34e   : > { %v727_v36 = vrot.slane %v726_v34, 1 }
 0x34f   : > { %v722_v37 = vadd.f32 %v721_v35, %v720_v33 }
 0x350   : > { %v728_v38 = vadd.f32 %v727_v36, %v726_v34 }
 0x351   : > { %1434 = vrcp.f32 %v722_v37 }
 0x352   : > { %1436 = vrcp.f32 %v728_v38 }
 0x35b   : > { %v1435_v39 = vpop.eup %1434 }
 0x35c   : > { %v1437_v40 = vpop.eup %1436  ;;  %v731_v41 = vmul.f32 %v1435_v39, %v1431_v25 }
 0x35d   : > { %v732_v42 = vmul.f32 %v1437_v40, %v1433_v26 }
 0x35e   : > { %v1338_v43 = vadd.f32 -0.0025, %v731_v41 }
 0x35f   : > { %v1339_v44 = vadd.f32 -0.0025, %v732_v42 }
 0x360   : > { %v739_v45 = vand.u32 2147483647, %v1338_v43  ;;  %v735_v49 = vmax.f32 %v1338_v43, 0.0 }
 0x361   : > { %v740_v46 = vand.u32 2147483647, %v1339_v44  ;;  %v736_v50 = vmax.f32 %v1339_v44, 0.0 }
 0x362   : > { %v741_v47 = vadd.f32 1e-12, %v739_v45  ;;  %v737_v51 = vmul.f32 %v735_v49, %v731_v41 }
 0x363   : > { %v742_v48 = vadd.f32 1e-12, %v740_v46  ;;  %v738_v53 = vmul.f32 %v736_v50, %v732_v42 }
 0x364   : > { %1438 = vrcp.f32 %v741_v47 }
 0x365   : > { %1440 = vrcp.f32 %v742_v48 }
 0x36e   : > { %v1439_v52 = vpop.eup %1438 }
 0x36f   : > { %v1441_v54 = vpop.eup %1440  ;;  %v745_v55 = vmul.f32 %v1439_v52, %v737_v51 }
 0x370   : > { %v746_v56 = vmul.f32 %v1441_v54, %v738_v53 }
 0x371   : > { %v747_v57 = vand.u32 2147483647, %v745_v55 }
 0x372   : > { %v748_v58 = vand.u32 2147483647, %v746_v56 }
 0x373   : > { %v749_v59 = vrot.slane %v747_v57, 4 }
 0x374   : > { %v755_v60 = vrot.slane %v748_v58, 4 }
 0x375   : > { %v750_v61 = vadd.f32 %v749_v59, %v747_v57 }
 0x376   : > { %v756_v62 = vadd.f32 %v755_v60, %v748_v58 }
 0x377   : > { %v751_v63 = vrot.slane %v750_v61, 2 }
 0x378   : > { %v757_v0 = vrot.slane %v756_v62, 2 }
 0x379   : > { %v752_v1 = vadd.f32 %v751_v63, %v750_v61 }
 0x37a   : > { %v758_v2 = vadd.f32 %v757_v0, %v756_v62 }
 0x37b   : > { %v753_v3 = vrot.slane %v752_v1, 1 }
 0x37c   : > { %v759_v5 = vrot.slane %v758_v2, 1 }
 0x37d   : > { %v754_v6 = vadd.f32 %v753_v3, %v752_v1 }
 0x37e   : > { %v760_v7 = vadd.f32 %v759_v5, %v758_v2 }
 0x37f   : > { %v761_v8 = vmax.f32 %v754_v6, 1e-12 }
 0x380   : > { %v762_v9 = vmax.f32 %v760_v7, 1e-12 }
 0x381   : > { %1442 = vrcp.f32 %v761_v8 }
 0x382   : > { %1444 = vrcp.f32 %v762_v9 }
 0x38b   : > { %v1443_v10 = vpop.eup %1442 }
 0x38c   : > { %v1445_v11 = vpop.eup %1444  ;;  %v765_v12 = vmul.f32 %v1443_v10, %v745_v55 }
 0x38d   : > { %v766_v13 = vmul.f32 %v1445_v11, %v746_v56 }
 0x38e   : > { %v767_v14 = vpack.c.bf16 %v765_v12, %v765_v12 }
 0x38f   : > { %v768_v15 = vpack.c.bf16 %v766_v13, %v766_v13 }
 0x390   : > { %v788_v16 = vsel %vm786_vm2, %v767_v14, 0 }
 0x391   : > { %1342 = vmatprep.subr.msk.bf16.mxu1 %vm786_vm2, %v768_v15 }
 0x392   : > { %794 = vmatpush1.bf16.msra.mxu1 %v788_v16 }
 0x395   : > { %1343 = vmatmul.mubr.msk.bf16.vlgmr.msra.gmra.mrb[12].mxu1 %vm779_vm3, %v1402_v17 }
 0x396   : > { %835 = vmatprep.mubr.bf16.mxu1 %v1486_v4 }
 0x39d   : > { %1344 = vmatmul.mubr.msk.bf16.gmra.mrb[16].mxu1 %vm779_vm3, %v1403_v18 }
 0x468   : > { %v827_v19 = vpop.f32.mrb[12].mxu1 }
 0x469   : > { %1060 = vst [vmem:[%s1628_s26] sm:$0xff] %v827_v19  ;;  %v829_v20 = vpop.f32.mrb[13].mxu1 }
 0x46a   : > { %1061 = vst [vmem:[%s1628_s26 + $0x8] sm:$0xff] %v829_v20  ;;  %v831_v21 = vpop.f32.mrb[14].mxu1 }
 0x46b   : > { %v851_v22 = vpack.c.bf16 %v831_v21, %v827_v19  ;;  %1062 = vst [vmem:[%s1628_s26 + $0x10] sm:$0xff] %v831_v21  ;;  %v833_v23 = vpop.f32.mrb[15].mxu1 }
 0x46c   : > { %v852_v24 = vpack.c.bf16 %v833_v23, %v829_v20  ;;  %1063 = vst [vmem:[%s1628_s26 + $0x18] sm:$0xff] %v833_v23 }
 0x46e   : > { %858 = vmatprep.subr.bf16.mxu0 %v852_v24 }
 0x46f   : > { %859 = vmatpush1.bf16.msra.mxu0 %v851_v22 }
 0x470   : > { %v837_v25 = vpop.f32.mrb[16].mxu1 }
 0x471   : > { %1064 = vst [vmem:[%s1628_s26 + $0x20] sm:$0xff] %v837_v25  ;;  %v839_v26 = vpop.f32.mrb[17].mxu1 }
 0x472   : > { %1065 = vst [vmem:[%s1628_s26 + $0x28] sm:$0xff] %v839_v26  ;;  %v841_v27 = vpop.f32.mrb[18].mxu1 }
 0x473   : > { %v853_v28 = vpack.c.bf16 %v841_v27, %v837_v25  ;;  %1066 = vst [vmem:[%s1628_s26 + $0x30] sm:$0xff] %v841_v27  ;;  %v843_v29 = vpop.f32.mrb[19].mxu1 }
 0x474   : > { %v854_v30 = vpack.c.bf16 %v843_v29, %v839_v26  ;;  %1067 = vst [vmem:[%s1628_s26 + $0x38] sm:$0xff] %v843_v29 }
 0x476   : > { %860 = vmatprep.subr.bf16.mxu0 %v854_v30 }
 0x477   : > { %861 = vmatpush1.bf16.msra.mxu0 %v853_v28 }
 0x47a   : > { %1345 = vmatmul.mubr.msk.bf16.vlgmr.msra.gmra.mrb[4].mxu0 %vm427_vm0, %v846_v31 }
 0x47b   : > { %1031 = vmatprep.mubr.bf16.mxu0 %v1486_v4 }
 0x54d   : > { %v892_v32 = vpop.f32.mrb[4].mxu0 }
 0x54e   : > { %v899_v33 = vsel %vm786_vm2, %v892_v32, -inf  ;;  %v894_v34 = vpop.f32.mrb[5].mxu0 }
 0x54f   : > { %v900_v35 = vrot.slane %v899_v33, 4  ;;  %v906_v36 = vsel %vm786_vm2, %v894_v34, -inf  ;;  %v896_v37 = vpop.f32.mrb[6].mxu0 }
 0x550   : > { %v907_v38 = vrot.slane %v906_v36, 4  ;;  %v897_v39 = vpop.f32.mrb[7].mxu0 }
 0x551   : > { %v901_v40 = vmax.f32 %v899_v33, %v900_v35 }
 0x552   : > { %v908_v41 = vmax.f32 %v906_v36, %v907_v38 }
 0x553   : > { %v902_v42 = vrot.slane %v901_v40, 2 }
 0x554   : > { %v909_v43 = vrot.slane %v908_v41, 2 }
 0x555   : > { %v903_v44 = vmax.f32 %v901_v40, %v902_v42 }
 0x556   : > { %v910_v45 = vmax.f32 %v908_v41, %v909_v43 }
 0x557   : > { %v904_v46 = vrot.slane %v903_v44, 1 }
 0x558   : > { %v911_v47 = vrot.slane %v910_v45, 1 }
 0x559   : > { %v905_v48 = vmax.f32 %v903_v44, %v904_v46 }
 0x55a   : > { %v912_v49 = vmax.f32 %v910_v45, %v911_v47 }
 0x55b   : > { %v913_v50 = vsub.f32 %v892_v32, %v905_v48 }
 0x55c   : > { %v914_v51 = vsub.f32 %v894_v34, %v912_v49 }
 0x55d   : > { %v915_v52 = vmul.f32 1.442695, %v913_v50  ;;  %v1404_v50 = vld [vmem:[%s1725_s6] sm:$0xff]  }
 0x55e   : > { %v917_v53 = vmul.f32 1.442695, %v914_v51  ;;  %v1405_v51 = vld [vmem:[%s1725_s6 + $0x8] sm:$0xff]  }
 0x55f   : > { %1446 = vpow2.f32 %v915_v52 }
 0x560   : > { %1448 = vpow2.f32 %v917_v53 }
 0x569   : > { %v1447_v54 = vpop.eup %1446 }
 0x56a   : > { %v1449_v55 = vpop.eup %1448  ;;  %v919_v56 = vsel %vm786_vm2, %v1447_v54, 0.0 }
 0x56b   : > { %v920_v57 = vrot.slane %v919_v56, 4  ;;  %v926_v58 = vsel %vm786_vm2, %v1449_v55, 0.0 }
 0x56c   : > { %v927_v59 = vrot.slane %v926_v58, 4 }
 0x56d   : > { %v921_v60 = vadd.f32 %v920_v57, %v919_v56 }
 0x56e   : > { %v928_v61 = vadd.f32 %v927_v59, %v926_v58  ;;  %v1106_v59 = vld [vmem:[%s1603_s20] sm:$0xff] (%p1568_p5) }
 0x56f   : > { %v922_v62 = vrot.slane %v921_v60, 2  ;;  %1107 = vst [vmem:[%s1093_s22] sm:$0xff] (%p1568_p5), %v1106_v59 }
 0x570   : > { %v929_v63 = vrot.slane %v928_v61, 2 }
 0x571   : > { %v923_v0 = vadd.f32 %v922_v62, %v921_v60  ;;  %v1108_v60 = vld [vmem:[%s1603_s20 + $0x8] sm:$0xff] (%p1568_p5)  ;;  %v1112_v62 = vld [vmem:[%s1603_s20 + $0x18] sm:$0xff] (%p1568_p5) }
 0x572   : > { %v930_v1 = vadd.f32 %v929_v63, %v928_v61  ;;  %v1110_v61 = vld [vmem:[%s1603_s20 + $0x10] sm:$0xff] (%p1568_p5)  ;;  %v1114_v63 = vld [vmem:[%s1603_s20 + $0x20] sm:$0xff] (%p1568_p5)  ;;  %1109 = vst [vmem:[%s1093_s22 + $0x8] sm:$0xff] (%p1568_p5), %v1108_v60  ;;  %1113 = vst [vmem:[%s1093_s22 + $0x28] sm:$0xff] (%p1568_p5), %v1112_v62 }
 0x573   : > { %v924_v2 = vrot.slane %v923_v0, 1  ;;  %1111 = vst [vmem:[%s1093_s22 + $0x20] sm:$0xff] (%p1568_p5), %v1110_v61  ;;  %1115 = vst [vmem:[%s1093_s22 + $0x40] sm:$0xff] (%p1568_p5), %v1114_v63 }
 0x574   : > { %v931_v3 = vrot.slane %v930_v1, 1 }
 0x575   : > { %v925_v5 = vadd.f32 %v924_v2, %v923_v0  ;;  %v1116_v0 = vld [vmem:[%s1603_s20 + $0x28] sm:$0xff] (%p1568_p5)  ;;  %v1120_v2 = vld [vmem:[%s1603_s20 + $0x38] sm:$0xff] (%p1568_p5) }
 0x576   : > { %v932_v6 = vadd.f32 %v931_v3, %v930_v1  ;;  %1117 = vst [vmem:[%s1093_s22 + $0x48] sm:$0xff] (%p1568_p5), %v1116_v0  ;;  %v1118_v1 = vld [vmem:[%s1603_s20 + $0x30] sm:$0xff] (%p1568_p5)  ;;  %1121 = vst [vmem:[%s1093_s22 + $0x68] sm:$0xff] (%p1568_p5), %v1120_v2 }
 0x577   : > { %1450 = vrcp.f32 %v925_v5  ;;  %1119 = vst [vmem:[%s1093_s22 + $0x60] sm:$0xff] (%p1568_p5), %v1118_v1 }
 0x578   : > { %1452 = vrcp.f32 %v932_v6 }
 0x581   : > { %v1451_v7 = vpop.eup %1450 }
 0x582   : > { %v1453_v8 = vpop.eup %1452  ;;  %v935_v9 = vmul.f32 %v1451_v7, %v1447_v54 }
 0x583   : > { %v936_v10 = vmul.f32 %v1453_v8, %v1449_v55 }
 0x584   : > { %v1346_v11 = vadd.f32 -0.0025, %v935_v9 }
 0x585   : > { %v1347_v12 = vadd.f32 -0.0025, %v936_v10 }
 0x586   : > { %v943_v13 = vand.u32 2147483647, %v1346_v11  ;;  %v939_v17 = vmax.f32 %v1346_v11, 0.0 }
 0x587   : > { %v944_v14 = vand.u32 2147483647, %v1347_v12  ;;  %v940_v18 = vmax.f32 %v1347_v12, 0.0 }
 0x588   : > { %v945_v15 = vadd.f32 1e-12, %v943_v13  ;;  %v941_v19 = vmul.f32 %v939_v17, %v935_v9 }
 0x589   : > { %v946_v16 = vadd.f32 1e-12, %v944_v14  ;;  %v942_v21 = vmul.f32 %v940_v18, %v936_v10 }
 0x58a   : > { %1454 = vrcp.f32 %v945_v15 }
 0x58b   : > { %1456 = vrcp.f32 %v946_v16 }
 0x594   : > { %v1455_v20 = vpop.eup %1454 }
 0x595   : > { %v1457_v22 = vpop.eup %1456  ;;  %v949_v23 = vmul.f32 %v1455_v20, %v941_v19 }
 0x596   : > { %v950_v24 = vmul.f32 %v1457_v22, %v942_v21 }
 0x597   : > { %v951_v25 = vand.u32 2147483647, %v949_v23 }
 0x598   : > { %v952_v26 = vand.u32 2147483647, %v950_v24 }
 0x599   : > { %v953_v27 = vsel %vm786_vm2, %v951_v25, 0.0 }
 0x59a   : > { %v960_v28 = vsel %vm786_vm2, %v952_v26, 0.0  ;;  %v954_v29 = vrot.slane %v953_v27, 4 }
 0x59b   : > { %v961_v30 = vrot.slane %v960_v28, 4 }
 0x59c   : > { %v955_v31 = vadd.f32 %v954_v29, %v953_v27 }
 0x59d   : > { %v962_v32 = vadd.f32 %v961_v30, %v960_v28 }
 0x59e   : > { %v956_v33 = vrot.slane %v955_v31, 2 }
 0x59f   : > { %v963_v34 = vrot.slane %v962_v32, 2 }
 0x5a0   : > { %v957_v35 = vadd.f32 %v956_v33, %v955_v31 }
 0x5a1   : > { %v964_v36 = vadd.f32 %v963_v34, %v962_v32 }
 0x5a2   : > { %v958_v37 = vrot.slane %v957_v35, 1 }
 0x5a3   : > { %v965_v38 = vrot.slane %v964_v36, 1 }
 0x5a4   : > { %v959_v39 = vadd.f32 %v958_v37, %v957_v35 }
 0x5a5   : > { %v966_v40 = vadd.f32 %v965_v38, %v964_v36 }
 0x5a6   : > { %v967_v41 = vmax.f32 %v959_v39, 1e-12 }
 0x5a7   : > { %v968_v42 = vmax.f32 %v966_v40, 1e-12 }
 0x5a8   : > { %1458 = vrcp.f32 %v967_v41 }
 0x5a9   : > { %1460 = vrcp.f32 %v968_v42 }
 0x5b2   : > { %v1459_v43 = vpop.eup %1458 }
 0x5b3   : > { %v1461_v44 = vpop.eup %1460  ;;  %v971_v45 = vmul.f32 %v1459_v43, %v949_v23 }
 0x5b4   : > { %v972_v46 = vmul.f32 %v1461_v44, %v950_v24 }
 0x5b5   : > { %v973_v47 = vpack.c.bf16 %v971_v45, %v971_v45 }
 0x5b6   : > { %v974_v48 = vpack.c.bf16 %v972_v46, %v972_v46 }
 0x5b7   : > { %v994_v49 = vsel %vm992_vm4, %v973_v47, 0 }
 0x5b8   : > { %1350 = vmatprep.subr.msk.bf16.mxu0 %vm992_vm4, %v974_v48 }
 0x5b9   : > { %1000 = vmatpush1.bf16.msra.mxu0 %v994_v49 }
 0x5bc   : > { %1351 = vmatmul.mubr.msk.bf16.vlgmr.msra.gmra.mrb[8].mxu0 %vm985_vm5, %v1404_v50 }
 0x5bd   : > { %1041 = vmatprep.mubr.bf16.mxu0 %v1486_v4 }
 0x5c4   : > { %1352 = vmatmul.mubr.msk.bf16.gmra.mrb[12].mxu0 %vm985_vm5, %v1405_v51 }
 0x68f   : > { %v1033_v52 = vpop.f32.mrb[8].mxu0 }
 0x690   : > { %1068 = vst [vmem:[%s1657_s18] sm:$0xff] %v1033_v52  ;;  %v1035_v53 = vpop.f32.mrb[9].mxu0 }
 0x691   : > { %1069 = vst [vmem:[%s1657_s18 + $0x8] sm:$0xff] %v1035_v53  ;;  %v1037_v4 = vpop.f32.mrb[10].mxu0 }
 0x692   : > { %1070 = vst [vmem:[%s1657_s18 + $0x10] sm:$0xff] %v1037_v4  ;;  %v1039_v54 = vpop.f32.mrb[11].mxu0 }
 0x693   : > { %1071 = vst [vmem:[%s1657_s18 + $0x18] sm:$0xff] %v1039_v54 }
 0x695   : > { %1090 = sbr.rel (!%p1568_p5) target bundleno = 1692 (0x69c), region = 90 }
 0x697   : > { %v1043_v55 = vpop.f32.mrb[12].mxu0 }
 0x698   : > { %1072 = vst [vmem:[%s1657_s18 + $0x20] sm:$0xff] %v1043_v55  ;;  %v1045_v56 = vpop.f32.mrb[13].mxu0 }
 0x699   : > { %1073 = vst [vmem:[%s1657_s18 + $0x28] sm:$0xff] %v1045_v56  ;;  %v1047_v57 = vpop.f32.mrb[14].mxu0 }
 0x69a   : > { %1074 = vst [vmem:[%s1657_s18 + $0x30] sm:$0xff] %v1047_v57  ;;  %v1049_v58 = vpop.f32.mrb[15].mxu0 }
 0x69b   : > { %1075 = vst [vmem:[%s1657_s18 + $0x38] sm:$0xff] %v1049_v58 }
 0x69c PF: > { %1127 = sbr.rel (!%p1568_p5) target bundleno = 1699 (0x6a3), region = 113  ;;  %s1366_s23 = sshll.u32 (%p1568_p5), %s1553_s12, 4  ;;  %v1143_v3 = vld [vmem:[%s1628_s26] sm:$0xff] (%p1568_p5)  ;;  %v1145_v5 = vld [vmem:[%s1628_s26 + $0x8] sm:$0xff] (%p1568_p5)  ;;  %v1147_v6 = vld [vmem:[%s1628_s26 + $0x10] sm:$0xff] (%p1568_p5) }
 0x69d   : > { %s1130_s25 = scalar_lea.vmem (%p1568_p5), %s1727_s8, %s1366_s23  ;;  %v1149_v7 = vld [vmem:[%s1628_s26 + $0x18] sm:$0xff] (%p1568_p5)  ;;  %v1151_v8 = vld [vmem:[%s1628_s26 + $0x20] sm:$0xff] (%p1568_p5)  ;;  %v1153_v9 = vld [vmem:[%s1628_s26 + $0x28] sm:$0xff] (%p1568_p5) }
 0x69e   : > { %1144 = vst [vmem:[%s1130_s25] sm:$0xff] (%p1568_p5), %v1143_v3  ;;  %1146 = vst [vmem:[%s1130_s25 + $0x8] sm:$0xff] (%p1568_p5), %v1145_v5  ;;  %v1155_v10 = vld [vmem:[%s1628_s26 + $0x30] sm:$0xff] (%p1568_p5)  ;;  %v1157_v11 = vld [vmem:[%s1628_s26 + $0x38] sm:$0xff] (%p1568_p5) }
 0x69f   : > { %1148 = vst [vmem:[%s1130_s25 + $0x20] sm:$0xff] (%p1568_p5), %v1147_v6  ;;  %1150 = vst [vmem:[%s1130_s25 + $0x28] sm:$0xff] (%p1568_p5), %v1149_v7 }
 0x6a0   : > { %1152 = vst [vmem:[%s1130_s25 + $0x40] sm:$0xff] (%p1568_p5), %v1151_v8  ;;  %1154 = vst [vmem:[%s1130_s25 + $0x48] sm:$0xff] (%p1568_p5), %v1153_v9 }
 0x6a1   : > { %1156 = vst [vmem:[%s1130_s25 + $0x60] sm:$0xff] (%p1568_p5), %v1155_v10  ;;  %1158 = vst [vmem:[%s1130_s25 + $0x68] sm:$0xff] (%p1568_p5), %v1157_v11 }
 0x6a3 PF: > { %1164 = sbr.rel (!%p1568_p5) target bundleno = 1706 (0x6aa), region = 136  ;;  %s1367_s27 = sshll.u32 (%p1568_p5), %s1553_s12, 4  ;;  %v1180_v12 = vld [vmem:[%s1657_s18] sm:$0xff] (%p1568_p5)  ;;  %v1182_v13 = vld [vmem:[%s1657_s18 + $0x8] sm:$0xff] (%p1568_p5)  ;;  %v1184_v14 = vld [vmem:[%s1657_s18 + $0x10] sm:$0xff] (%p1568_p5) }
 0x6a4   : > { %s1167_s29 = scalar_lea.vmem (%p1568_p5), %s1728_s9, %s1367_s27  ;;  %v1186_v15 = vld [vmem:[%s1657_s18 + $0x18] sm:$0xff] (%p1568_p5)  ;;  %v1188_v16 = vld [vmem:[%s1657_s18 + $0x20] sm:$0xff] (%p1568_p5)  ;;  %v1190_v17 = vld [vmem:[%s1657_s18 + $0x28] sm:$0xff] (%p1568_p5) }
 0x6a5   : > { %1181 = vst [vmem:[%s1167_s29] sm:$0xff] (%p1568_p5), %v1180_v12  ;;  %1183 = vst [vmem:[%s1167_s29 + $0x8] sm:$0xff] (%p1568_p5), %v1182_v13  ;;  %v1192_v18 = vld [vmem:[%s1657_s18 + $0x30] sm:$0xff] (%p1568_p5)  ;;  %v1194_v19 = vld [vmem:[%s1657_s18 + $0x38] sm:$0xff] (%p1568_p5) }
 0x6a6   : > { %1185 = vst [vmem:[%s1167_s29 + $0x20] sm:$0xff] (%p1568_p5), %v1184_v14  ;;  %1187 = vst [vmem:[%s1167_s29 + $0x28] sm:$0xff] (%p1568_p5), %v1186_v15 }
 0x6a7   : > { %1189 = vst [vmem:[%s1167_s29 + $0x40] sm:$0xff] (%p1568_p5), %v1188_v16  ;;  %1191 = vst [vmem:[%s1167_s29 + $0x48] sm:$0xff] (%p1568_p5), %v1190_v17 }
 0x6a8   : > { %1193 = vst [vmem:[%s1167_s29 + $0x60] sm:$0xff] (%p1568_p5), %v1192_v18  ;;  %1195 = vst [vmem:[%s1167_s29 + $0x68] sm:$0xff] (%p1568_p5), %v1194_v19 }
 0x6aa PF: > { %p17_p10 = scmp.ge.s32.totalorder %s1556_s13, 4   ;;  %s1730_s30 = smov %s1480_s10 }
 0x6ab   : > { %s1731_s10 = smov %s1566_s16  ;;  %s1732_s11 = smov %s1556_s13 }
 0x6ac   :  { %19 = sbr.rel (!%p17_p10) target bundleno = 2 (0x2), region = 214 }

</bundles_post_ra>
